<compile_context>
chip_gen: v7x
topology: tpu7x:2x2x1
jax: 0.10.0
libtpu: 0.0.40
codegen_flags: <defaults>
</compile_context>

<pallas_src>
import math
from collections import namedtuple

import jax
import jax.numpy as jnp
from jax.experimental import pallas as pl
from jax.experimental.pallas import tpu as pltpu


# ---------------------------------------------------------------------------
# Kernel bodies.
# ---------------------------------------------------------------------------
def _matmul_bias_kernel(x_ref, w_ref, b_ref, o_ref):
    # x: (TN, K), w: (K, M), b: (1, M), o: (TN, M)
    acc = jnp.dot(x_ref[...], w_ref[...], preferred_element_type=jnp.float32)
    o_ref[...] = (acc + b_ref[...].astype(jnp.float32)).astype(o_ref.dtype)


def _matmul_kernel(x_ref, w_ref, o_ref):
    acc = jnp.dot(x_ref[...], w_ref[...], preferred_element_type=jnp.float32)
    o_ref[...] = acc.astype(o_ref.dtype)


def _acc_matmul_bias_kernel(x_ref, w_ref, b_ref, o_ref, acc_ref):
    # Grid (G, N/TN, K/TK); axis 2 is the K reduction (last, "arbitrary").
    @pl.when(pl.program_id(2) == 0)
    def _init():
        acc_ref[...] = jnp.zeros_like(acc_ref)

    acc_ref[...] += jnp.dot(x_ref[...], w_ref[...],
                            preferred_element_type=jnp.float32)

    @pl.when(pl.program_id(2) == pl.num_programs(2) - 1)
    def _finalize():
        o_ref[...] = (acc_ref[...] + b_ref[...].astype(jnp.float32)
                      ).astype(o_ref.dtype)


def _acc_matmul_kernel(x_ref, w_ref, o_ref, acc_ref):
    @pl.when(pl.program_id(2) == 0)
    def _init():
        acc_ref[...] = jnp.zeros_like(acc_ref)

    acc_ref[...] += jnp.dot(x_ref[...], w_ref[...],
                            preferred_element_type=jnp.float32)

    @pl.when(pl.program_id(2) == pl.num_programs(2) - 1)
    def _finalize():
        o_ref[...] = acc_ref[...].astype(o_ref.dtype)


# ---------------------------------------------------------------------------
# Tile-size / VMEM budgeting helpers.
# ---------------------------------------------------------------------------
_Cfg = namedtuple("_Cfg", ["capacity", "budget", "max_tn", "k_tile_limit"])

# Flipped to False (once) if this jax/libtpu rejects pl.Buffered(1) single
# buffering of the resident weight/bias blocks.
_ALLOW_SINGLE_BUFFER = True


def _cdiv(a, b):
    return -(-a // b)


def _round_up(x, m):
    return ((x + m - 1) // m) * m


def _sublane(dtype):
    # Sublane packing multiple: 8 rows f32, 16 bf16, 32 int8/fp8.
    return max(8, 32 // jnp.dtype(dtype).itemsize)


def _vmem_capacity_bytes():
    """Per-core VMEM capacity (128 MiB v5e/v6e, 64 MiB v7x); safe fallback."""
    try:
        info = pltpu.get_tpu_info()
        cap = getattr(info, "vmem_capacity_bytes", None)
        if cap:
            return int(cap)
    except Exception:
        pass
    return 64 << 20  # conservative: v7x per-TC size


def _choose_tile_n(n_rows, per_row_bytes, fixed_bytes, budget_bytes,
                   sublane, max_tn):
    """Largest N tile (sublane multiple) fitting the VMEM budget.

    per_row_bytes must already include buffering factors (e.g. 2x for
    double-buffered streaming tiles); fixed_bytes covers resident blocks.
    """
    avail = max(budget_bytes - fixed_bytes, sublane * per_row_bytes)
    tn = avail // per_row_bytes
    tn = max(sublane, (tn // sublane) * sublane)
    tn = min(tn, max_tn)
    tn = min(tn, _round_up(n_rows, sublane))
    # Multi-TC (v7x) friendliness: keep >= ~4 grid steps along N for large N,
    # but never shrink the tile below 256 rows (per-step overhead ~0.35us).
    tn = min(tn, max(_round_up(_cdiv(n_rows, 4), sublane), 256))
    return int(tn)


def _choose_tile_k(ig, og, w_isz, limit_bytes):
    """Largest K tile: multiple of 128, divides Ig, double-buffered (tk, Og)
    weight block within limit_bytes (only used when Ig % 128 == 0)."""
    if 2 * ig * og * w_isz <= limit_bytes or ig <= 128:
        return ig
    tk = (limit_bytes // (2 * og * w_isz)) // 128 * 128
    tk = min(max(tk, 128), ig)
    while ig % tk:
        tk -= 128
    return int(tk)


def _compiler_params(est_vmem_bytes, semantics, capacity):
    # Never clamp the scoped-VMEM limit below the estimated working set
    # (unless it physically cannot fit), but leave headroom under capacity.
    limit = max(est_vmem_bytes + (8 << 20), 32 << 20)
    limit = min(limit, capacity - (2 << 20))
    limit = max(limit, 16 << 20)
    return pltpu.CompilerParams(
        dimension_semantics=semantics,
        vmem_limit_bytes=int(limit),
    )


def _resident_spec(block_shape, index_map, single_buffer):
    """BlockSpec for a grid-invariant (or slowly varying) block: single
    buffered to halve its VMEM footprint (feeds into a larger N tile)."""
    if single_buffer:
        return pl.BlockSpec(block_shape, index_map,
                            pipeline_mode=pl.Buffered(1))
    return pl.BlockSpec(block_shape, index_map)


def _resident_call(fn, *args):
    """Call fn with single-buffered resident blocks; fall back to default
    double buffering if this jax/libtpu rejects pl.Buffered(1)."""
    global _ALLOW_SINGLE_BUFFER
    if _ALLOW_SINGLE_BUFFER:
        try:
            return fn(*args, single_buffer=True)
        except Exception:
            _ALLOW_SINGLE_BUFFER = False
    return fn(*args, single_buffer=False)


# ---------------------------------------------------------------------------
# Fused (block-diagonal) path: one lane-dense matmul covering all groups.
# Only used when per-group widths are well below the MXU tile (<128).
# ---------------------------------------------------------------------------
def make_block_diagonal_weight(weight):
    """Precompute (and cache alongside the params) the (G*Ig, G*Og)
    block-diagonal weight used by the fused path."""
    num_g, ig, og = weight.shape
    eye = jnp.eye(num_g, dtype=weight.dtype)
    return (weight[:, :, None, :] * eye[:, None, :, None]).reshape(
        num_g * ig, num_g * og)


def _fused_forward(x2d, w_bd, bias_row, out_dtype, cfg, single_buffer):
    n_rows, k_dim = x2d.shape
    m_dim = w_bd.shape[1]

    x_isz = x2d.dtype.itemsize
    o_isz = jnp.dtype(out_dtype).itemsize
    w_isz = w_bd.dtype.itemsize
    sublane = _sublane(x2d.dtype)

    wbuf = 1 if single_buffer else 2
    fixed = wbuf * k_dim * m_dim * w_isz
    if bias_row is not None:
        fixed += wbuf * m_dim * bias_row.dtype.itemsize
    per_row = 2 * (k_dim * x_isz + m_dim * o_isz)        # double-buffered x/out
    tn = _choose_tile_n(n_rows, per_row, fixed, cfg.budget, sublane, cfg.max_tn)
    est_vmem = tn * per_row + fixed

    in_specs = [
        pl.BlockSpec((tn, k_dim), lambda n: (n, 0)),
        _resident_spec((k_dim, m_dim), lambda n: (0, 0), single_buffer),
    ]
    operands = [x2d, w_bd]
    if bias_row is not None:
        in_specs.append(_resident_spec((1, m_dim), lambda n: (0, 0),
                                       single_buffer))
        operands.append(bias_row)
        kernel = _matmul_bias_kernel
    else:
        kernel = _matmul_kernel

    flops = 2 * n_rows * k_dim * m_dim                    # actual MXU work
    bytes_acc = (x2d.size * x_isz + w_bd.size * w_isz + n_rows * m_dim * o_isz
                 + (bias_row.size * bias_row.dtype.itemsize
                    if bias_row is not None else 0))

    # TODO(synk): when G*Og < 128 the output stores are masked (vst.msk);
    # padding the output lanes to 128 + a post-slice trades an extra HBM pass
    # for unmasked stores -- not a clear win, so left unpadded.
    return pl.pallas_call(
        kernel,
        out_shape=jax.ShapeDtypeStruct((n_rows, m_dim), out_dtype),
        grid_spec=pltpu.PrefetchScalarGridSpec(
            num_scalar_prefetch=0,
            grid=(_cdiv(n_rows, tn),),
            in_specs=in_specs,
            out_specs=pl.BlockSpec((tn, m_dim), lambda n: (n, 0)),
        ),
        compiler_params=_compiler_params(est_vmem, ("parallel",), cfg.capacity),
        cost_estimate=pl.CostEstimate(flops=flops, transcendentals=0,
                                      bytes_accessed=int(bytes_acc)),
    )(*operands)


# ---------------------------------------------------------------------------
# Per-group "flat" path: native layout views (no HBM transposes), grid
# (G, N/TN, Ig/TK) with f32 accumulator over the K reduction axis.
# Requires Ig % 128 == 0 and Og % 128 == 0 (lane-aligned blocks).
# ---------------------------------------------------------------------------
def _per_group_flat_forward(x2d, weight, bias_g, out_dtype, cfg):
    n_rows = x2d.shape[0]
    num_g, ig, og = weight.shape

    x_isz = x2d.dtype.itemsize
    o_isz = jnp.dtype(out_dtype).itemsize
    w_isz = weight.dtype.itemsize
    sublane = _sublane(x2d.dtype)

    tk = _choose_tile_k(ig, og, w_isz, cfg.k_tile_limit)
    kt = ig // tk
    kb = kt  # K blocks per group along the flattened (G*Ig) axis

    fixed = 2 * tk * og * w_isz                           # weight K tile (2x)
    if bias_g is not None:
        fixed += 2 * og * bias_g.dtype.itemsize
    per_row = 2 * tk * x_isz + 2 * og * o_isz + og * 4    # + f32 accumulator
    tn = _choose_tile_n(n_rows, per_row, fixed, cfg.budget, sublane, cfg.max_tn)
    est_vmem = tn * per_row + fixed

    in_specs = [
        pl.BlockSpec((tn, tk), lambda g, n, k: (n, g * kb + k)),
        pl.BlockSpec((None, tk, og), lambda g, n, k: (g, k, 0)),
    ]
    operands = [x2d, weight]
    if bias_g is not None:
        in_specs.append(pl.BlockSpec((None, 1, og), lambda g, n, k: (g, 0, 0)))
        operands.append(bias_g)
        kernel = _acc_matmul_bias_kernel
    else:
        kernel = _acc_matmul_kernel

    flops = 2 * n_rows * num_g * ig * og
    bytes_acc = (x2d.size * x_isz + weight.size * w_isz
                 + n_rows * num_g * og * o_isz
                 + (bias_g.size * bias_g.dtype.itemsize
                    if bias_g is not None else 0))

    # TODO(synk): Og (output width per group) is not tiled; extremely large Og
    # would need a fourth grid axis.
    return pl.pallas_call(
        kernel,
        out_shape=jax.ShapeDtypeStruct((n_rows, num_g * og), out_dtype),
        grid_spec=pltpu.PrefetchScalarGridSpec(
            num_scalar_prefetch=0,
            grid=(num_g, _cdiv(n_rows, tn), kt),
            in_specs=in_specs,
            out_specs=pl.BlockSpec((tn, og), lambda g, n, k: (n, g)),
            scratch_shapes=[pltpu.VMEM((tn, og), jnp.float32)],
        ),
        compiler_params=_compiler_params(
            est_vmem, ("parallel", "parallel", "arbitrary"), cfg.capacity),
        cost_estimate=pl.CostEstimate(flops=flops, transcendentals=0,
                                      bytes_accessed=int(bytes_acc)),
    )(*operands)


# ---------------------------------------------------------------------------
# Fallback per-group path: (G, N, Ig) transposed layout (always tileable),
# per-group weight resident across the inner N axis.
# ---------------------------------------------------------------------------
def _per_group_transposed_forward(xg, weight, bias_g, out_dtype, cfg,
                                  single_buffer):
    num_g, n_rows, ig = xg.shape
    og = weight.shape[2]

    x_isz = xg.dtype.itemsize
    o_isz = jnp.dtype(out_dtype).itemsize
    w_isz = weight.dtype.itemsize
    sublane = _sublane(xg.dtype)

    wbuf = 1 if single_buffer else 2
    fixed = wbuf * ig * og * w_isz
    if bias_g is not None:
        fixed += wbuf * og * bias_g.dtype.itemsize
    per_row = 2 * (ig * x_isz + og * o_isz)
    tn = _choose_tile_n(n_rows, per_row, fixed, cfg.budget, sublane, cfg.max_tn)
    est_vmem = tn * per_row + fixed

    in_specs = [
        pl.BlockSpec((None, tn, ig), lambda g, n: (g, n, 0)),
        _resident_spec((None, ig, og), lambda g, n: (g, 0, 0), single_buffer),
    ]
    operands = [xg, weight]
    if bias_g is not None:
        in_specs.append(_resident_spec((None, 1, og), lambda g, n: (g, 0, 0),
                                       single_buffer))
        operands.append(bias_g)
        kernel = _matmul_bias_kernel
    else:
        kernel = _matmul_kernel

    flops = 2 * num_g * n_rows * ig * og
    bytes_acc = (xg.size * x_isz + weight.size * w_isz
                 + num_g * n_rows * og * o_isz
                 + (bias_g.size * bias_g.dtype.itemsize
                    if bias_g is not None else 0))

    return pl.pallas_call(
        kernel,
        out_shape=jax.ShapeDtypeStruct((num_g, n_rows, og), out_dtype),
        grid_spec=pltpu.PrefetchScalarGridSpec(
            num_scalar_prefetch=0,
            grid=(num_g, _cdiv(n_rows, tn)),
            in_specs=in_specs,
            out_specs=pl.BlockSpec((None, tn, og), lambda g, n: (g, n, 0)),
        ),
        compiler_params=_compiler_params(
            est_vmem, ("parallel", "parallel"), cfg.capacity),
        cost_estimate=pl.CostEstimate(flops=flops, transcendentals=0,
                                      bytes_accessed=int(bytes_acc)),
    )(*operands)


# ---------------------------------------------------------------------------
# Public wrapper.
# ---------------------------------------------------------------------------
def grouped_linear(x, weight, bias=None, *, fused_weight=None,
                   vmem_budget_bytes=None, fuse_weight_limit_bytes=None,
                   k_tile_limit_bytes=None):
    """Forward of GroupedLinear: einsum('...gi,gij->...gj', x, weight) + bias.

    x: (..., G, Ig); weight: (G, Ig, Og); bias: (G, Og) or None.
    fused_weight: optional precomputed make_block_diagonal_weight(weight)
    (cache it alongside the params to avoid rebuilding it every call).
    """
    *lead, g_x, ig = x.shape
    num_g, ig_w, og = weight.shape
    if g_x != num_g or ig_w != ig:
        raise ValueError(f"shape mismatch: x {x.shape} vs weight {weight.shape}")
    n_rows = int(math.prod(lead)) if lead else 1
    out_dtype = x.dtype

    if n_rows == 0:
        return jnp.zeros((*lead, num_g, og), dtype=out_dtype)

    # Generation-aware VMEM sizing (128 MiB v5e/v6e, 64 MiB per-core v7x).
    capacity = _vmem_capacity_bytes()
    budget = (capacity * 3) // 8 if vmem_budget_bytes is None else vmem_budget_bytes
    max_tn = 2048 if capacity >= (96 << 20) else 1024
    fuse_limit = (min(8 << 20, max(budget // 6, 1 << 20))
                  if fuse_weight_limit_bytes is None else fuse_weight_limit_bytes)
    k_limit = (max(budget // 4, 1 << 20)
               if k_tile_limit_bytes is None else k_tile_limit_bytes)
    cfg = _Cfg(capacity=capacity, budget=budget, max_tn=max_tn,
               k_tile_limit=k_limit)

    fused_w_bytes = (num_g * ig) * (num_g * og) * weight.dtype.itemsize
    small_group = (ig < 128) or (og < 128)   # group too narrow to fill the MXU

    if small_group and fused_w_bytes <= fuse_limit:
        # Fused block-diagonal path: no transposes, one wide matmul per tile.
        x2d = x.reshape(n_rows, num_g * ig)                       # free view
        if fused_weight is None or fused_weight.shape != (num_g * ig, num_g * og):
            fused_weight = make_block_diagonal_weight(weight)
        bias_row = None if bias is None else bias.reshape(1, num_g * og)
        out2d = _resident_call(_fused_forward, x2d, fused_weight, bias_row,
                               out_dtype, cfg)
        return out2d.reshape(*lead, num_g, og)                    # free view

    if ig % 128 == 0 and og % 128 == 0:
        # Wide, lane-aligned groups: native-layout per-group path, K tiled.
        x2d = x.reshape(n_rows, num_g * ig)                       # free view
        bias_g = None if bias is None else bias.reshape(num_g, 1, og)
        out2d = _per_group_flat_forward(x2d, weight, bias_g, out_dtype, cfg)
        return out2d.reshape(*lead, num_g, og)                    # free view

    # Fallback for oddly-shaped groups: pays two HBM transposes but is always
    # tileable.  TODO(synk): no K tiling here; very large non-aligned Ig*Og
    # falls back to bigger vmem_limit rather than K blocking.
    xg = jnp.transpose(x.reshape(n_rows, num_g, ig), (1, 0, 2))
    bias_g = None if bias is None else bias.reshape(num_g, 1, og)
    out = _resident_call(_per_group_transposed_forward, xg, weight, bias_g,
                         out_dtype, cfg)
    return jnp.transpose(out, (1, 0, 2)).reshape(*lead, num_g, og)


def init_params(key, in_features, out_features, num_groups, dtype=jnp.float32):
    """Deterministic kaiming-uniform-style init matching the PyTorch shapes."""
    ig = in_features // num_groups
    og = out_features // num_groups
    kw, kb = jax.random.split(key)
    bound = 1.0 / math.sqrt(ig)   # kaiming_uniform(a=sqrt(5)) -> 1/sqrt(fan_in)
    weight = jax.random.uniform(
        kw, (num_groups, ig, og), dtype=dtype, minval=-bound, maxval=bound)
    bias = jax.random.uniform(
        kb, (num_groups, og), dtype=dtype, minval=-bound, maxval=bound)
    return weight, bias


if __name__ == "__main__":
    key = jax.random.PRNGKey(0)
    k_x, k_p, k_x2, k_p2 = jax.random.split(key, 4)
    HI = jax.lax.Precision.HIGHEST

    # --- Small per-group widths -> fused block-diagonal path ----------------
    batch, seq = 2, 8
    in_features, out_features, num_groups = 32, 32, 4
    ig = in_features // num_groups
    og = out_features // num_groups

    x = jax.random.normal(k_x, (batch, seq, num_groups, ig), dtype=jnp.float32)
    weight, bias = init_params(k_p, in_features, out_features, num_groups)
    ref = jnp.einsum("...gi,gij->...gj", x, weight, precision=HI) + bias

    out = jax.block_until_ready(grouped_linear(x, weight, bias))
    assert out.shape == (batch, seq, num_groups, og), out.shape
    assert jnp.allclose(out, ref, atol=1e-4, rtol=1e-4), float(
        jnp.max(jnp.abs(out - ref)))

    # bias=None fast path (bias-less kernel, no zeros array materialized).
    out_nb = jax.block_until_ready(grouped_linear(x, weight, None))
    assert jnp.allclose(out_nb, ref - bias, atol=1e-4, rtol=1e-4), float(
        jnp.max(jnp.abs(out_nb - (ref - bias))))

    # Precomputed / cached block-diagonal weight (hoisted out of hot path).
    w_bd = make_block_diagonal_weight(weight)
    out_c = jax.block_until_ready(grouped_linear(x, weight, bias,
                                                 fused_weight=w_bd))
    assert jnp.allclose(out_c, ref, atol=1e-4, rtol=1e-4), float(
        jnp.max(jnp.abs(out_c - ref)))

    # --- Wide, 128-aligned groups -> native-layout per-group path (K tiled) -
    g2, ig2, og2 = 2, 256, 128
    x2 = jax.random.normal(k_x2, (batch, seq, g2, ig2), dtype=jnp.float32)
    w2, b2 = init_params(k_p2, g2 * ig2, g2 * og2, g2)
    ref2 = jnp.einsum("...gi,gij->...gj", x2, w2, precision=HI) + b2
    # k_tile_limit forces TK=128 -> 2 reduction steps, exercising the f32
    # accumulator + pl.when init/finalize logic.
    out2 = jax.block_until_ready(
        grouped_linear(x2, w2, b2, k_tile_limit_bytes=2 * 128 * og2 * 4))
    assert out2.shape == (batch, seq, g2, og2), out2.shape
    assert jnp.allclose(out2, ref2, atol=1e-4, rtol=1e-4), float(
        jnp.max(jnp.abs(out2 - ref2)))

    # --- Fallback per-group path (forced via fuse_weight_limit_bytes=0) -----
    out_pg = jax.block_until_ready(
        grouped_linear(x, weight, bias, fuse_weight_limit_bytes=0))
    assert jnp.allclose(out_pg, ref, atol=1e-4, rtol=1e-4), float(
        jnp.max(jnp.abs(out_pg - ref)))

    print("KERNEL_OK")
</pallas_src>

<mosaic_0001>
module attributes {stable_mosaic.version = 11 : i64} {
  func.func @_matmul_bias_kernel(%arg0: i32, %arg1: memref<16x32xf32, #tpu.memory_space<vmem>>, %arg2: memref<32x32xf32, #tpu.memory_space<vmem>>, %arg3: memref<1x32xf32, #tpu.memory_space<vmem>>, %arg4: memref<16x32xf32, #tpu.memory_space<vmem>>) attributes {dimension_semantics = [#tpu.dimension_semantics<parallel>], iteration_bounds = array<i64: 1>, scalar_prefetch = 0 : i64, scratch_operands = 0 : i64, tpu.core_type = #tpu.core_type<tc>, window_params = [{transform_indices = @transform_0, window_bounds = array<i64: 16, 32>}, {pipeline_mode = #tpu.pipeline_mode<synchronous>, transform_indices = @transform_1, window_bounds = array<i64: 32, 32>}, {pipeline_mode = #tpu.pipeline_mode<synchronous>, transform_indices = @transform_2, window_bounds = array<i64: 1, 32>}, {transform_indices = @transform_3, window_bounds = array<i64: 16, 32>}]} {
    %c0 = arith.constant 0 : index
    %c0_0 = arith.constant 0 : index
    %0 = vector.load %arg1[%c0, %c0_0] : memref<16x32xf32, #tpu.memory_space<vmem>>, vector<16x32xf32>
    %c0_1 = arith.constant 0 : index
    %c0_2 = arith.constant 0 : index
    %1 = vector.load %arg2[%c0_1, %c0_2] : memref<32x32xf32, #tpu.memory_space<vmem>>, vector<32x32xf32>
    %cst = arith.constant dense<0.000000e+00> : vector<16x32xf32>
    %2 = tpu.matmul %0, %1, %cst {dimension_numbers = #tpu.dot_dimension_numbers<[1], [0], [0], [1], [0, 0, 1, 1], [], []>} : vector<16x32xf32>, vector<32x32xf32>, vector<16x32xf32> -> vector<16x32xf32>
    %c0_3 = arith.constant 0 : index
    %c0_4 = arith.constant 0 : index
    %3 = vector.load %arg3[%c0_3, %c0_4] : memref<1x32xf32, #tpu.memory_space<vmem>>, vector<1x32xf32>
    %4 = vector.broadcast %3 : vector<1x32xf32> to vector<16x32xf32>
    %5 = arith.addf %2, %4 : vector<16x32xf32>
    %c0_5 = arith.constant 0 : index
    %c0_6 = arith.constant 0 : index
    %6 = vector.load %arg4[%c0_5, %c0_6] : memref<16x32xf32, #tpu.memory_space<vmem>>, vector<16x32xf32>
    tpu.vector_store %arg4[%c0_5, %c0_6], %5 {strides = array<i32>} : memref<16x32xf32, #tpu.memory_space<vmem>>, vector<16x32xf32>,
    return
  }
  func.func @transform_0(%arg0: i32) -> (i32, i32) {
    %c0_i32 = arith.constant 0 : i32
    %c0_i32_0 = arith.constant 0 : i32
    return %arg0, %c0_i32 : i32, i32
  }
  func.func @transform_1(%arg0: i32) -> (i32, i32) {
    %c0_i32 = arith.constant 0 : i32
    %c0_i32_0 = arith.constant 0 : i32
    %c0_i32_1 = arith.constant 0 : i32
    return %c0_i32, %c0_i32_0 : i32, i32
  }
  func.func @transform_2(%arg0: i32) -> (i32, i32) {
    %c0_i32 = arith.constant 0 : i32
    %c0_i32_0 = arith.constant 0 : i32
    %c0_i32_1 = arith.constant 0 : i32
    return %c0_i32, %c0_i32_0 : i32, i32
  }
  func.func @transform_3(%arg0: i32) -> (i32, i32) {
    %c0_i32 = arith.constant 0 : i32
    %c0_i32_0 = arith.constant 0 : i32
    return %arg0, %c0_i32 : i32, i32
  }
}

module attributes {stable_mosaic.version = 11 : i64} {
  func.func @_matmul_bias_kernel(%arg0: i32, %arg1: memref<16x32xf32, #tpu.memory_space<vmem>>, %arg2: memref<32x32xf32, #tpu.memory_space<vmem>>, %arg3: memref<1x32xf32, #tpu.memory_space<vmem>>, %arg4: memref<16x32xf32, #tpu.memory_space<vmem>>) attributes {dimension_semantics = [#tpu.dimension_semantics<parallel>], iteration_bounds = array<i64: 1>, scalar_prefetch = 0 : i64, scratch_operands = 0 : i64, tpu.core_type = #tpu.core_type<tc>, window_params = [{transform_indices = @transform_0, window_bounds = array<i64: 16, 32>}, {pipeline_mode = #tpu.pipeline_mode<synchronous>, transform_indices = @transform_1, window_bounds = array<i64: 32, 32>}, {pipeline_mode = #tpu.pipeline_mode<synchronous>, transform_indices = @transform_2, window_bounds = array<i64: 1, 32>}, {transform_indices = @transform_3, window_bounds = array<i64: 16, 32>}]} {
    %c0 = arith.constant 0 : index
    %c0_0 = arith.constant 0 : index
    %0 = vector.load %arg1[%c0, %c0_0] : memref<16x32xf32, #tpu.memory_space<vmem>>, vector<16x32xf32>
    %c0_1 = arith.constant 0 : index
    %c0_2 = arith.constant 0 : index
    %1 = vector.load %arg2[%c0_1, %c0_2] : memref<32x32xf32, #tpu.memory_space<vmem>>, vector<32x32xf32>
    %cst = arith.constant dense<0.000000e+00> : vector<16x32xf32>
    %2 = tpu.matmul %0, %1, %cst {dimension_numbers = #tpu.dot_dimension_numbers<[1], [0], [0], [1], [0, 0, 1, 1], [], []>} : vector<16x32xf32>, vector<32x32xf32>, vector<16x32xf32> -> vector<16x32xf32>
    %c0_3 = arith.constant 0 : index
    %c0_4 = arith.constant 0 : index
    %3 = vector.load %arg3[%c0_3, %c0_4] : memref<1x32xf32, #tpu.memory_space<vmem>>, vector<1x32xf32>
    %4 = vector.broadcast %3 : vector<1x32xf32> to vector<16x32xf32>
    %5 = arith.addf %2, %4 : vector<16x32xf32>
    %c0_5 = arith.constant 0 : index
    %c0_6 = arith.constant 0 : index
    %6 = vector.load %arg4[%c0_5, %c0_6] : memref<16x32xf32, #tpu.memory_space<vmem>>, vector<16x32xf32>
    tpu.vector_store %arg4[%c0_5, %c0_6], %5 {strides = array<i32>} : memref<16x32xf32, #tpu.memory_space<vmem>>, vector<16x32xf32>,
    return
  }
  func.func @transform_0(%arg0: i32) -> (i32, i32) {
    %c0_i32 = arith.constant 0 : i32
    %c0_i32_0 = arith.constant 0 : i32
    return %arg0, %c0_i32 : i32, i32
  }
  func.func @transform_1(%arg0: i32) -> (i32, i32) {
    %c0_i32 = arith.constant 0 : i32
    %c0_i32_0 = arith.constant 0 : i32
    %c0_i32_1 = arith.constant 0 : i32
    return %c0_i32, %c0_i32_0 : i32, i32
  }
  func.func @transform_2(%arg0: i32) -> (i32, i32) {
    %c0_i32 = arith.constant 0 : i32
    %c0_i32_0 = arith.constant 0 : i32
    %c0_i32_1 = arith.constant 0 : i32
    return %c0_i32, %c0_i32_0 : i32, i32
  }
  func.func @transform_3(%arg0: i32) -> (i32, i32) {
    %c0_i32 = arith.constant 0 : i32
    %c0_i32_0 = arith.constant 0 : i32
    return %arg0, %c0_i32 : i32, i32
  }
}

</mosaic_0001>

<bundles_post_ra>
// kernel: tpu_custom_call.1
= control target key start
LH: loop header
LB: loop body
LE: loop exit
PB: predicated region body
PF: predicated region fallthrough
CT: control target
= control target key end

     0   :  { %8 = vsyncpa [#allocation3], 0  ;;  %s340_s0 = inlined_call_operand.hbm [shape: f32[16,32], index: 0, kind: input, shape index: {}]   ;;  %s341_s1 = inlined_call_operand.hbm [shape: f32[32,32], index: 1, kind: input, shape index: {}]   ;;  %s342_s2 = inlined_call_operand.vmem [shape: f32[1,32], index: 2, kind: input, shape index: {}]   ;;  %s343_s3 = inlined_call_operand.hbm [shape: f32[16,32], index: 3, kind: output, shape index: {}]  }
   0x1   :  { %9 = vsyncpa [#allocation6], 0 }
   0x2   :  { %10 = vsyncpa [#allocation4], 0  ;;  %s263_s12 = smov [#allocation2]   ;;  %s191_s16 = scalar_lea.hbm %s340_s0, 256 }
   0x3   :  { %s16_s13 = sshll.u32 %s263_s12, 4  ;;  %p192_p0 = scmp.ne.s32.totalorder %s340_s0, %s191_s16  ;;  %s17_s13 = int_to_ptr.vmem [resolvable:$true] %s16_s13 }
   0x4   :  { %p195_p1 = scmp.lt.u32.totalorder %s191_s16, %s340_s0 }
   0x6   :  { %p197_p2 = pnand %p195_p1, %p192_p0 }
   0x8   :  { %200 = shalt.err (!%p197_p2)
}
   0x9   :  { %s201_s21 = scalar_lea.vmem %s17_s13, 256  ;;  %p206_p4 = scmp.lt.s32.totalorder %s17_s13, %s17_s13 }
   0xa   :  { %p202_p3 = scmp.ne.s32.totalorder %s17_s13, %s201_s21  ;;  %p207_p5 = scmp.lt.s32.totalorder %s201_s21, %s201_s21 }
   0xc   :  { %p208_p6 = por %p207_p5, %p206_p4 }
   0xe   :  { %p209_p7 = pnand %p208_p6, %p202_p3 }
  0x10   :  { %212 = shalt.err (!%p209_p7)
}
  0x11   :  { %s264_s22 = smov 128   ;;  %s265_s23 = smov 8  }
  0x12   :  { %22 = dma.hbm_to_vmem [thread:$0]  %s340_s0, 256, %s17_s13, [#allocation3], %s264_s22, %s264_s22, %s265_s23  }
  0x13   :  { %s266_s26 = smov [#allocation5]   ;;  %s213_s30 = scalar_lea.hbm %s341_s1, 512 }
  0x14   :  { %s28_s27 = sshll.u32 %s266_s26, 4  ;;  %p214_p8 = scmp.ne.s32.totalorder %s341_s1, %s213_s30  ;;  %s29_s27 = int_to_ptr.vmem [resolvable:$true] %s28_s27 }
  0x15   :  { %p217_p9 = scmp.lt.u32.totalorder %s213_s30, %s341_s1 }
  0x17   :  { %p219_p10 = pnand %p217_p9, %p214_p8 }
  0x19   :  { %222 = shalt.err (!%p219_p10)
}
  0x1a   :  { %s223_s8 = scalar_lea.vmem %s29_s27, 512  ;;  %p228_p12 = scmp.lt.s32.totalorder %s29_s27, %s29_s27 }
  0x1b   :  { %p224_p11 = scmp.ne.s32.totalorder %s29_s27, %s223_s8  ;;  %p229_p13 = scmp.lt.s32.totalorder %s223_s8, %s223_s8 }
  0x1d   :  { %p230_p0 = por %p229_p13, %p228_p12 }
  0x1f   :  { %p231_p1 = pnand %p230_p0, %p224_p11 }
  0x21   :  { %234 = shalt.err (!%p231_p1)
}
  0x22   :  { %34 = dma.hbm_to_vmem [thread:$0]  %s341_s1, 512, %s29_s27, [#allocation6], %s264_s22, %s264_s22, %s265_s23  }
  0x23   :  { %257 = dma.done.wait [#allocation3], 256  }
  0x24   :  { %258 = vsyncadd [#allocation3], 4294967040 }
  0x25   :  { %259 = dma.done.wait [#allocation6], 512  }
  0x26   :  { %260 = vsyncadd [#allocation6], 4294966784  ;;  %vm56_vm0 = vcmask 261120   ;;  %v45_v0 = vld [vmem:[#allocation5] sm:$0xff]  ;;  %v46_v1 = vld [vmem:[#allocation5 + $0x8] sm:$0xff]  ;;  %s267_s11 = smov [#allocation7]  }
  0x27   :  { %v47_v2 = vld [vmem:[#allocation5 + $0x10] sm:$0xff]  ;;  %v178_v3 = vpack.c.bf16 %v46_v1, %v45_v0  ;;  %v48_v4 = vld [vmem:[#allocation5 + $0x18] sm:$0xff]  ;;  %s145_s12 = sshll.u32 %s267_s11, 4  ;;  %s146_s12 = int_to_ptr.vmem [resolvable:$true] %s145_s12 }
  0x28   :  { %v43_v5 = vld [vmem:[#allocation2] sm:$0xff]  ;;  %v182_v6 = vpack.c.bf16 %v48_v4, %v47_v2  ;;  %v44_v7 = vld [vmem:[#allocation2 + $0x8] sm:$0xff]  ;;  %s235_s13 = scalar_lea.vmem %s146_s12, 256  ;;  %p240_p3 = scmp.lt.s32.totalorder %s146_s12, %s146_s12 }
  0x29   :  { %175 = vmatprep.mubr.msk.f32.mxu0 %vm56_vm0, %v43_v5  ;;  %179 = vmatprep.subr.bf16.mxu0 %v178_v3  ;;  %v158_v8 = vld [vmem:[%s342_s2] ss:$0 sm:$0xff]  ;;  %p236_p2 = scmp.ne.s32.totalorder %s146_s12, %s235_s13  ;;  %p241_p4 = scmp.lt.s32.totalorder %s235_s13, %s235_s13 }
  0x2a   :  { %181 = vmatpush3.bf16.msra.mxu0 %v178_v3 }
  0x2b   :  { %183 = vmatprep.subr.bf16.mxu0 %v182_v6  ;;  %p242_p5 = por %p241_p4, %p240_p3 }
  0x2d   :  { %p243_p6 = pnand %p242_p5, %p236_p2 }
  0x2e   :  { %185 = vmatpush3.bf16.msra.mxu0 %v182_v6 }
  0x31   :  { %176 = vmatmul.mubr.msk.f32.vlgmr.msra.gmra.mrb[0].mxu0 %vm56_vm0, %v44_v7 }
 0x104   :  { %v177_v9 = vpop.f32.mrb[0].mxu0 }
 0x105   :  { %v135_v10 = vadd.f32 %v177_v9, %v158_v8  ;;  %v129_v11 = vpop.f32.mrb[1].mxu0 }
 0x106   :  { %v130_v12 = vadd.f32 %v158_v8, %v129_v11 }
 0x107   :  { %139 = vst.msk [vmem:[#allocation7 + $0x8] sm:$0xff] %vm56_vm0, %v135_v10 }
 0x108   :  { %138 = vst.msk [vmem:[#allocation7] sm:$0xff] %vm56_vm0, %v130_v12 }
 0x109   :  { %246 = shalt.err (!%p243_p6)
}
 0x10a   :  { %s247_s15 = scalar_lea.hbm %s343_s3, 256 }
 0x10b   :  { %p248_p7 = scmp.ne.s32.totalorder %s343_s3, %s247_s15  ;;  %p251_p8 = scmp.lt.u32.totalorder %s247_s15, %s343_s3 }
 0x10d   :  { %p253_p9 = pnand %p251_p8, %p248_p7 }
 0x10f   :  { %256 = shalt.err (!%p253_p9)
}
 0x110   :  { %151 = dma.vmem_to_hbm [thread:$0]  %s146_s12, 256, %s343_s3, [#allocation4], %s264_s22, %s264_s22, %s265_s23  }
 0x111   :  { %261 = dma.done.wait [#allocation4], 256  }
 0x112   :  { %262 = vsyncadd [#allocation4], 4294967040 }
 0x113   :  { %155 = vsyncpa [#allocation3], 1 }
 0x114   :  { %156 = vsyncpa [#allocation6], 1 }
 0x115   :  { %157 = vsyncpa [#allocation4], 1 }

// kernel: tpu_custom_call.1
= control target key start
LH: loop header
LB: loop body
LE: loop exit
PB: predicated region body
PF: predicated region fallthrough
CT: control target
= control target key end

     0   :  { %8 = vsyncpa [#allocation3], 0  ;;  %s340_s0 = inlined_call_operand.hbm [shape: f32[16,32], index: 0, kind: input, shape index: {}]   ;;  %s341_s1 = inlined_call_operand.hbm [shape: f32[32,32], index: 1, kind: input, shape index: {}]   ;;  %s342_s2 = inlined_call_operand.vmem [shape: f32[1,32], index: 2, kind: input, shape index: {}]   ;;  %s343_s3 = inlined_call_operand.hbm [shape: f32[16,32], index: 3, kind: output, shape index: {}]  }
   0x1   :  { %9 = vsyncpa [#allocation6], 0 }
   0x2   :  { %10 = vsyncpa [#allocation4], 0  ;;  %s263_s12 = smov [#allocation2]   ;;  %s191_s16 = scalar_lea.hbm %s340_s0, 256 }
   0x3   :  { %s16_s13 = sshll.u32 %s263_s12, 4  ;;  %p192_p0 = scmp.ne.s32.totalorder %s340_s0, %s191_s16  ;;  %s17_s13 = int_to_ptr.vmem [resolvable:$true] %s16_s13 }
   0x4   :  { %p195_p1 = scmp.lt.u32.totalorder %s191_s16, %s340_s0 }
   0x6   :  { %p197_p2 = pnand %p195_p1, %p192_p0 }
   0x8   :  { %200 = shalt.err (!%p197_p2)
}
   0x9   :  { %s201_s21 = scalar_lea.vmem %s17_s13, 256  ;;  %p206_p4 = scmp.lt.s32.totalorder %s17_s13, %s17_s13 }
   0xa   :  { %p202_p3 = scmp.ne.s32.totalorder %s17_s13, %s201_s21  ;;  %p207_p5 = scmp.lt.s32.totalorder %s201_s21, %s201_s21 }
   0xc   :  { %p208_p6 = por %p207_p5, %p206_p4 }
   0xe   :  { %p209_p7 = pnand %p208_p6, %p202_p3 }
  0x10   :  { %212 = shalt.err (!%p209_p7)
}
  0x11   :  { %s264_s22 = smov 128   ;;  %s265_s23 = smov 8  }
  0x12   :  { %22 = dma.hbm_to_vmem [thread:$0]  %s340_s0, 256, %s17_s13, [#allocation3], %s264_s22, %s264_s22, %s265_s23  }
  0x13   :  { %s266_s26 = smov [#allocation5]   ;;  %s213_s30 = scalar_lea.hbm %s341_s1, 512 }
  0x14   :  { %s28_s27 = sshll.u32 %s266_s26, 4  ;;  %p214_p8 = scmp.ne.s32.totalorder %s341_s1, %s213_s30  ;;  %s29_s27 = int_to_ptr.vmem [resolvable:$true] %s28_s27 }
  0x15   :  { %p217_p9 = scmp.lt.u32.totalorder %s213_s30, %s341_s1 }
  0x17   :  { %p219_p10 = pnand %p217_p9, %p214_p8 }
  0x19   :  { %222 = shalt.err (!%p219_p10)
}
  0x1a   :  { %s223_s8 = scalar_lea.vmem %s29_s27, 512  ;;  %p228_p12 = scmp.lt.s32.totalorder %s29_s27, %s29_s27 }
  0x1b   :  { %p224_p11 = scmp.ne.s32.totalorder %s29_s27, %s223_s8  ;;  %p229_p13 = scmp.lt.s32.totalorder %s223_s8, %s223_s8 }
  0x1d   :  { %p230_p0 = por %p229_p13, %p228_p12 }
  0x1f   :  { %p231_p1 = pnand %p230_p0, %p224_p11 }
  0x21   :  { %234 = shalt.err (!%p231_p1)
}
  0x22   :  { %34 = dma.hbm_to_vmem [thread:$0]  %s341_s1, 512, %s29_s27, [#allocation6], %s264_s22, %s264_s22, %s265_s23  }
  0x23   :  { %257 = dma.done.wait [#allocation3], 256  }
  0x24   :  { %258 = vsyncadd [#allocation3], 4294967040 }
  0x25   :  { %259 = dma.done.wait [#allocation6], 512  }
  0x26   :  { %260 = vsyncadd [#allocation6], 4294966784  ;;  %vm56_vm0 = vcmask 261120   ;;  %v45_v0 = vld [vmem:[#allocation5] sm:$0xff]  ;;  %v46_v1 = vld [vmem:[#allocation5 + $0x8] sm:$0xff]  ;;  %s267_s11 = smov [#allocation7]  }
  0x27   :  { %v47_v2 = vld [vmem:[#allocation5 + $0x10] sm:$0xff]  ;;  %v178_v3 = vpack.c.bf16 %v46_v1, %v45_v0  ;;  %v48_v4 = vld [vmem:[#allocation5 + $0x18] sm:$0xff]  ;;  %s145_s12 = sshll.u32 %s267_s11, 4  ;;  %s146_s12 = int_to_ptr.vmem [resolvable:$true] %s145_s12 }
  0x28   :  { %v43_v5 = vld [vmem:[#allocation2] sm:$0xff]  ;;  %v182_v6 = vpack.c.bf16 %v48_v4, %v47_v2  ;;  %v44_v7 = vld [vmem:[#allocation2 + $0x8] sm:$0xff]  ;;  %s235_s13 = scalar_lea.vmem %s146_s12, 256  ;;  %p240_p3 = scmp.lt.s32.totalorder %s146_s12, %s146_s12 }
  0x29   :  { %175 = vmatprep.mubr.msk.f32.mxu0 %vm56_vm0, %v43_v5  ;;  %179 = vmatprep.subr.bf16.mxu0 %v178_v3  ;;  %v158_v8 = vld [vmem:[%s342_s2] ss:$0 sm:$0xff]  ;;  %p236_p2 = scmp.ne.s32.totalorder %s146_s12, %s235_s13  ;;  %p241_p4 = scmp.lt.s32.totalorder %s235_s13, %s235_s13 }
  0x2a   :  { %181 = vmatpush3.bf16.msra.mxu0 %v178_v3 }
  0x2b   :  { %183 = vmatprep.subr.bf16.mxu0 %v182_v6  ;;  %p242_p5 = por %p241_p4, %p240_p3 }
  0x2d   :  { %p243_p6 = pnand %p242_p5, %p236_p2 }
  0x2e   :  { %185 = vmatpush3.bf16.msra.mxu0 %v182_v6 }
  0x31   :  { %176 = vmatmul.mubr.msk.f32.vlgmr.msra.gmra.mrb[0].mxu0 %vm56_vm0, %v44_v7 }
 0x104   :  { %v177_v9 = vpop.f32.mrb[0].mxu0 }
 0x105   :  { %v135_v10 = vadd.f32 %v177_v9, %v158_v8  ;;  %v129_v11 = vpop.f32.mrb[1].mxu0 }
 0x106   :  { %v130_v12 = vadd.f32 %v158_v8, %v129_v11 }
 0x107   :  { %139 = vst.msk [vmem:[#allocation7 + $0x8] sm:$0xff] %vm56_vm0, %v135_v10 }
 0x108   :  { %138 = vst.msk [vmem:[#allocation7] sm:$0xff] %vm56_vm0, %v130_v12 }
 0x109   :  { %246 = shalt.err (!%p243_p6)
}
 0x10a   :  { %s247_s15 = scalar_lea.hbm %s343_s3, 256 }
 0x10b   :  { %p248_p7 = scmp.ne.s32.totalorder %s343_s3, %s247_s15  ;;  %p251_p8 = scmp.lt.u32.totalorder %s247_s15, %s343_s3 }
 0x10d   :  { %p253_p9 = pnand %p251_p8, %p248_p7 }
 0x10f   :  { %256 = shalt.err (!%p253_p9)
}
 0x110   :  { %151 = dma.vmem_to_hbm [thread:$0]  %s146_s12, 256, %s343_s3, [#allocation4], %s264_s22, %s264_s22, %s265_s23  }
 0x111   :  { %261 = dma.done.wait [#allocation4], 256  }
 0x112   :  { %262 = vsyncadd [#allocation4], 4294967040 }
 0x113   :  { %155 = vsyncpa [#allocation3], 1 }
 0x114   :  { %156 = vsyncpa [#allocation6], 1 }
 0x115   :  { %157 = vsyncpa [#allocation4], 1 }

</bundles_post_ra>
